<compile_context>
chip_gen: v7x
topology: tpu7x:2x2x1
jax: 0.10.0
libtpu: 0.0.40
codegen_flags: <defaults>
</compile_context>

<pallas_src>
import math

import jax
import jax.numpy as jnp
from jax import lax
from jax.experimental import pallas as pl
from jax.experimental.pallas import tpu as pltpu


# ----------------------------------------------------------------------------- glue ops
def conv_identity_params(in_spatial, desired_kernel):
    """stride-1 'same' conv: force odd kernel, pad=(k-1)//2 (mirrors util.conv_identity_params)."""
    k = min(desired_kernel, in_spatial)
    if k % 2 == 0:
        k = max(1, k - 1)
    return k, (k - 1) // 2


def unfold(x, k, pad):
    """torch.nn.Unfold(kernel_size=k, padding=pad), stride 1 -> (N, C*k*k, H*W) native layout."""
    N, C, H, W = x.shape
    xp = jnp.pad(x, ((0, 0), (0, 0), (pad, pad), (pad, pad)))
    cols = []
    for ki in range(k):
        for kj in range(k):
            cols.append(xp[:, :, ki:ki + H, kj:kj + W])       # (N, C, H, W)
    cols = jnp.stack(cols, axis=2)                            # (N, C, K2, H, W)
    return cols.reshape(N, C * k * k, H * W)                  # dim1 index = c*K2 + kk


def fold(inp, C, k, H, W, pad):
    """torch.nn.Fold(kernel_size=k, output_size=(H,W), padding=pad), stride 1.
    inp: (N, C*k*k, H*W), dim 1 interpreted row-major as (C, k, k) — exactly Fold's convention."""
    N = inp.shape[0]
    inp = inp.reshape(N, C, k, k, H, W)
    out = jnp.zeros((N, C, H + 2 * pad, W + 2 * pad), dtype=inp.dtype)
    for ki in range(k):
        for kj in range(k):
            out = out.at[:, :, ki:ki + H, kj:kj + W].add(inp[:, :, ki, kj])
    return out[:, :, pad:pad + H, pad:pad + W]


# ----------------------------------------------------------------------------- Pallas kernel
def _reverb_kernel(x_ref, w_ref, mb_ref, out_ref):
    """One grid step per OUTPUT node v; the entire u reduction lives in one MXU contraction."""
    xp = x_ref[0]                       # (CK2p, S)       f32  unfolded patches of node v (zero-pad rows)
    w = w_ref[0]                        # (U, CK2p, S)    bf16 combined=(weight+prior)*mask for target v
    mb = mb_ref[0]                      # (K2*C, U*CK2p)  bf16 mask * chan_map in Fold layout for target v
    # meta[u*CK2p + i, s] = combined[u, i, s] * xp[i, s]   (xp is shared across all source nodes u)
    # f32 elementwise multiply (v5e-friendly); CK2p % 8 == 0 -> the collapse is tile-aligned.
    meta = (w * xp[None, :, :]).reshape(-1, xp.shape[-1])     # (U*CK2p, S) f32
    # Channel mixing + scrambled Fold re-layout + u reduction + second mask application,
    # all in ONE bf16 MXU dot with f32 accumulation; single lane-dense store.
    out_ref[0] = jnp.dot(mb, meta.astype(jnp.bfloat16),
                         preferred_element_type=jnp.float32)


# ----------------------------------------------------------------------------- param prep (init / update time)
def prepare_reverb_params(weight, prior, chan_map, mask, *, k):
    """Re-lay out the parameters into kernel layout ONCE (off the forward hot path).

    Returns:
      w_prep : (U_v, U_u, CK2p, S)    bf16  combined = (weight + prior) * mask, zero-padded rows
      mb_prep: (U_v, K2*C, U_u*CK2p)  bf16  mask * chan_map expanded to the module's Fold layout
    """
    U = weight.shape[0]
    S1, S2, C = weight.shape[2], weight.shape[3], weight.shape[4]
    S, K2 = S1 * S2, k * k
    CK2 = C * K2
    CK2p = ((CK2 + 15) // 16) * 16        # pad per-u slab to a bf16 sublane-tile multiple
    f32 = jnp.float32

    m = mask.astype(f32)

    # combined = (weight + prior) * mask  -> (U_u, U_v, C*K2, S), lane-dense spatial axis last.
    comb = (weight.astype(f32).reshape(U, U, S, C, K2)
            + prior.astype(f32).reshape(U, U, 1, C, K2))
    comb = comb * m[:, :, None, None, None]                       # first mask application
    comb = comb.transpose(0, 1, 3, 4, 2).reshape(U, U, CK2, S)
    comb = jnp.pad(comb, ((0, 0), (0, 0), (0, CK2p - CK2), (0, 0)))
    w_prep = comb.transpose(1, 0, 2, 3).astype(jnp.bfloat16)      # (U_v, U_u, CK2p, S)

    # mb[u, v, kk*C + o, c*K2 + kk'] = mask[u,v] * chan_map[u,v,c,o] * delta(kk, kk')
    # (fuses the channel mix with the module's [kk, o]-major Fold layout).
    eye = jnp.eye(K2, dtype=f32)
    mb = (chan_map.astype(f32).transpose(0, 1, 3, 2)[:, :, None, :, :, None]
          * eye[None, None, :, None, None, :]).reshape(U, U, K2 * C, CK2)
    mb = mb * m[:, :, None, None]                                 # second mask application
    mb = jnp.pad(mb, ((0, 0), (0, 0), (0, 0), (0, CK2p - CK2)))
    # flatten u right next to the padded slab so column index = u*CK2p + (c*K2 + kk')
    mb_prep = mb.transpose(1, 2, 0, 3).reshape(U, K2 * C, U * CK2p).astype(jnp.bfloat16)
    return w_prep, mb_prep


# ----------------------------------------------------------------------------- forward (hot path)
def elegant_reverb_forward(x, w_prep, mb_prep, *, k, pad):
    """Forward pass of ElegantReverb. x: (U, C, S1, S2). Returns (U, C, S1, S2)."""
    U, C, S1, S2 = x.shape
    S, K2 = S1 * S2, k * k
    CK2, K2C = C * K2, K2 * C
    CK2p = w_prep.shape[2]
    f32 = jnp.float32

    # Only x-dependent layout work on the hot path: unfold + zero-pad the per-u slab rows.
    xp = unfold(x.astype(f32), k, pad)                            # (U, C*K2, S)
    xp = jnp.pad(xp, ((0, 0), (0, CK2p - CK2), (0, 0)))           # (U, CK2p, S)

    ufld_out = pl.pallas_call(
        _reverb_kernel,
        out_shape=jax.ShapeDtypeStruct((U, K2C, S), f32),
        grid=(U,),
        in_specs=[
            pl.BlockSpec((1, CK2p, S), lambda v: (v, 0, 0)),           # x patches of node v
            pl.BlockSpec((1, U, CK2p, S), lambda v: (v, 0, 0, 0)),     # combined weight, all u for node v
            pl.BlockSpec((1, K2C, U * CK2p), lambda v: (v, 0, 0)),     # expanded chan_map for node v
        ],
        out_specs=pl.BlockSpec((1, K2C, S), lambda v: (v, 0, 0)),
        compiler_params=pltpu.CompilerParams(
            dimension_semantics=("parallel",)),                       # v7x: 2 TCs split the (even) v grid
    )(xp, w_prep, mb_prep)

    # Kernel output is already in the module's (scrambled, [kk, o]-major) Fold input layout.
    return fold(ufld_out, C, k, S1, S2, pad)                          # (U, C, S1, S2)


# ----------------------------------------------------------------------------- pure-JAX reference
def ref_forward(x, weight, prior, chan_map, mask, k, pad):
    U, C, S1, S2 = x.shape
    S, K2 = S1 * S2, k * k
    xufld = unfold(x, k, pad)                                          # (U, C*K2, S)
    xufld = xufld.reshape(U, C, K2, S).transpose(0, 3, 1, 2)           # (U, S, C, K2)
    w_r = weight.reshape(U, U, S, C, K2)
    p_r = prior.reshape(U, U, 1, C, K2)
    m = mask[:, :, None, None, None]
    combined = w_r * m + jnp.broadcast_to(p_r, w_r.shape) * m
    meta = combined * xufld[None]                                      # (U, U, S, C, K2)
    mapped = jnp.einsum('uvsck,uvco->uvsok', meta, chan_map,
                        precision=lax.Precision.HIGHEST)
    mapped = mapped * m
    ufld_meta = mapped.sum(0)                                          # (U, S, C(o), K2)
    ufld_meta = ufld_meta.transpose(0, 1, 3, 2).reshape(U, S, K2 * C).transpose(0, 2, 1)
    return fold(ufld_meta, C, k, S1, S2, pad)


# ----------------------------------------------------------------------------- main
if __name__ == "__main__":
    U, C, S1, S2 = 4, 4, 16, 16        # num_nodes, channels, spatial1, spatial2
    desired_kernel = 3
    k, pad = conv_identity_params(S1, desired_kernel)

    key = jax.random.PRNGKey(0)
    kw, kp, kc, kx = jax.random.split(key, 4)

    def xavier_normal(rng, shape):
        recep = math.prod(shape[2:]) if len(shape) > 2 else 1
        fan_in, fan_out = shape[1] * recep, shape[0] * recep
        std = math.sqrt(2.0 / (fan_in + fan_out))
        return std * jax.random.normal(rng, shape, dtype=jnp.float32)

    weight = xavier_normal(kw, (U, U, S1, S2, C, k, k))
    prior = xavier_normal(kp, (U, U, C, k, k))
    chan_map = xavier_normal(kc, (U, U, C, C))
    mask = jnp.ones((U, U), dtype=jnp.float32).at[:, 0].set(0.0)
    x = jax.random.uniform(kx, (U, C, S1, S2), dtype=jnp.float32)      # activations in [0, 1)

    # init / update()-time re-layout — NOT part of the per-forward hot path.
    w_prep, mb_prep = prepare_reverb_params(weight, prior, chan_map, mask, k=k)

    fwd = jax.jit(lambda xx, wp, mp: elegant_reverb_forward(xx, wp, mp, k=k, pad=pad))
    out = jax.block_until_ready(fwd(x, w_prep, mb_prep))

    ref = jax.block_until_ready(ref_forward(x, weight, prior, chan_map, mask, k, pad))
    assert out.shape == (U, C, S1, S2)
    err = float(jnp.max(jnp.abs(out - ref)))
    scale = float(jnp.max(jnp.abs(ref)))
    # bf16 weight storage + bf16 MXU inputs (f32 accumulation) per the perf review; the
    # tolerance is sized for that numerics choice (ref is full-f32 HIGHEST).
    assert err < 2e-2 * scale + 1e-3, f"max abs err {err} (ref scale {scale})"

    print("KERNEL_OK")
</pallas_src>

<mosaic_0001>
module attributes {stable_mosaic.version = 11 : i64} {
  func.func @_reverb_kernel(%arg0: i32, %arg1: memref<1x48x256xf32, #tpu.memory_space<vmem>>, %arg2: memref<1x4x48x256xbf16, #tpu.memory_space<vmem>>, %arg3: memref<1x36x192xbf16, #tpu.memory_space<vmem>>, %arg4: memref<1x36x256xf32, #tpu.memory_space<vmem>>) attributes {dimension_semantics = [#tpu.dimension_semantics<parallel>], iteration_bounds = array<i64: 4>, scalar_prefetch = 0 : i64, scratch_operands = 0 : i64, tpu.core_type = #tpu.core_type<tc>, window_params = [{transform_indices = @transform_0, window_bounds = array<i64: 1, 48, 256>}, {transform_indices = @transform_1, window_bounds = array<i64: 1, 4, 48, 256>}, {transform_indices = @transform_2, window_bounds = array<i64: 1, 36, 192>}, {transform_indices = @transform_3, window_bounds = array<i64: 1, 36, 256>}]} {
    %c0 = arith.constant 0 : index
    %c0_0 = arith.constant 0 : index
    %c0_1 = arith.constant 0 : index
    %0 = vector.load %arg1[%c0, %c0_0, %c0_1] : memref<1x48x256xf32, #tpu.memory_space<vmem>>, vector<1x48x256xf32>
    %1 = vector.shape_cast %0 : vector<1x48x256xf32> to vector<48x256xf32>
    %c0_2 = arith.constant 0 : index
    %c0_3 = arith.constant 0 : index
    %c0_4 = arith.constant 0 : index
    %c0_5 = arith.constant 0 : index
    %2 = vector.load %arg2[%c0_2, %c0_3, %c0_4, %c0_5] : memref<1x4x48x256xbf16, #tpu.memory_space<vmem>>, vector<1x4x48x256xbf16>
    %3 = vector.shape_cast %2 : vector<1x4x48x256xbf16> to vector<4x48x256xbf16>
    %c0_6 = arith.constant 0 : index
    %c0_7 = arith.constant 0 : index
    %c0_8 = arith.constant 0 : index
    %4 = vector.load %arg3[%c0_6, %c0_7, %c0_8] : memref<1x36x192xbf16, #tpu.memory_space<vmem>>, vector<1x36x192xbf16>
    %5 = vector.shape_cast %4 : vector<1x36x192xbf16> to vector<36x192xbf16>
    %6 = vector.shape_cast %1 : vector<48x256xf32> to vector<1x48x256xf32>
    %7 = arith.extf %3 : vector<4x48x256xbf16> to vector<4x48x256xf32>
    %8 = vector.broadcast %6 : vector<1x48x256xf32> to vector<4x48x256xf32>
    %9 = arith.mulf %7, %8 : vector<4x48x256xf32>
    %10 = vector.shape_cast %9 : vector<4x48x256xf32> to vector<192x256xf32>
    %11 = arith.truncf %10 : vector<192x256xf32> to vector<192x256xbf16>
    %cst = arith.constant dense<0.000000e+00> : vector<36x256xf32>
    %12 = tpu.matmul %5, %11, %cst {dimension_numbers = #tpu.dot_dimension_numbers<[1], [0], [0], [1], [0, 0, 1, 1], [], []>} : vector<36x192xbf16>, vector<192x256xbf16>, vector<36x256xf32> -> vector<36x256xf32>
    %c0_9 = arith.constant 0 : index
    %c0_10 = arith.constant 0 : index
    %c0_11 = arith.constant 0 : index
    %13 = vector.load %arg4[%c0_9, %c0_10, %c0_11] : memref<1x36x256xf32, #tpu.memory_space<vmem>>, vector<1x36x256xf32>
    %14 = vector.shape_cast %13 : vector<1x36x256xf32> to vector<36x256xf32>
    %15 = vector.shape_cast %12 : vector<36x256xf32> to vector<1x36x256xf32>
    tpu.vector_store %arg4[%c0_9, %c0_10, %c0_11], %15 {strides = array<i32>} : memref<1x36x256xf32, #tpu.memory_space<vmem>>, vector<1x36x256xf32>,
    return
  }
  func.func @transform_0(%arg0: i32) -> (i32, i32, i32) {
    %c0_i32 = arith.constant 0 : i32
    %c0_i32_0 = arith.constant 0 : i32
    %c0_i32_1 = arith.constant 0 : i32
    return %arg0, %c0_i32, %c0_i32_0 : i32, i32, i32
  }
  func.func @transform_1(%arg0: i32) -> (i32, i32, i32, i32) {
    %c0_i32 = arith.constant 0 : i32
    %c0_i32_0 = arith.constant 0 : i32
    %c0_i32_1 = arith.constant 0 : i32
    %c0_i32_2 = arith.constant 0 : i32
    return %arg0, %c0_i32, %c0_i32_0, %c0_i32_1 : i32, i32, i32, i32
  }
  func.func @transform_2(%arg0: i32) -> (i32, i32, i32) {
    %c0_i32 = arith.constant 0 : i32
    %c0_i32_0 = arith.constant 0 : i32
    %c0_i32_1 = arith.constant 0 : i32
    return %arg0, %c0_i32, %c0_i32_0 : i32, i32, i32
  }
  func.func @transform_3(%arg0: i32) -> (i32, i32, i32) {
    %c0_i32 = arith.constant 0 : i32
    %c0_i32_0 = arith.constant 0 : i32
    %c0_i32_1 = arith.constant 0 : i32
    return %arg0, %c0_i32, %c0_i32_0 : i32, i32, i32
  }
}

</mosaic_0001>

<bundles_post_ra>
// kernel: _lambda_.1
= control target key start
LH: loop header
LB: loop body
LE: loop exit
PB: predicated region body
PF: predicated region fallthrough
CT: control target
= control target key end

     0   :  { %s649_s12 = smov 0   ;;  %s800_s0 = inlined_call_operand.vmem [shape: f32[4,48,256], index: 0, kind: input, shape index: {}]   ;;  %s801_s1 = inlined_call_operand.vmem [shape: bf16[4,4,48,256], index: 1, kind: input, shape index: {}]   ;;  %s802_s2 = inlined_call_operand.vmem [shape: bf16[4,36,192], index: 2, kind: input, shape index: {}]   ;;  %s803_s3 = inlined_call_operand.vmem [shape: f32[4,36,256], index: 3, kind: output, shape index: {}]  }
   0x1 LB: > { %s557_s13 = sadd.s32 4294967295, %s627_s12   ;;  %p561_p0 = scmp.ge.s32.totalorder %s627_s12, 1  ;;  %s627_s12 = sphi %s649_s12, %s13_s12  }
   0x2   : > { %p157_p1 = scmp.lt.s32.totalorder %s627_s12, 5 }
   0x4   : > { %p158_p2 = pnand %p561_p0, %p157_p1 }
   0x5   : > { %p191_p3 = scmp.lt.s32.totalorder (!%p158_p2), %s557_s13, 3  ;;  %vm397_vm0 = vcmask (!%p158_p2), 523264  }
   0x6   : > { %161 = sbr.rel (%p158_p2) target bundleno = 296 (0x128), region = 32 }
   0xd   : > { %s805_s13 = smov (!%p191_p3, %s557_s13), 3 }
   0xe   : > { %s601_s14 = smul.u32 96, %s805_s13 }
   0xf   : > { %s602_s15 = smul.u32 192, %s805_s13 }
  0x10   : > { %s664_s18 = scalar_lea.vmem %s800_s0, %s601_s14  ;;  %s603_s22 = smul.u32 40, %s805_s13 }
  0x11   : > { %s669_s21 = scalar_lea.vmem %s801_s1, %s602_s15  ;;  %v672_v0 = vld [vmem:[%s664_s18 + $0x8] sm:$0xff]  ;;  %v675_v1 = vld [vmem:[%s664_s18 + $0x18] sm:$0xff]  ;;  %v678_v2 = vld [vmem:[%s664_s18] sm:$0xff]  ;;  %s604_s26 = smul.u32 80, %s805_s13 }
  0x12   : > { %v224_v3 = vld [vmem:[%s669_s21] sm:$0xff]  ;;  %v225_v4 = vld [vmem:[%s669_s21 + $0x8] sm:$0xff]  ;;  %v683_v5 = vld [vmem:[%s664_s18 + $0x10] sm:$0xff]  ;;  %s735_s25 = scalar_lea.vmem %s802_s2, %s603_s22 }
  0x13   : > { %v254_v6 = vunpack.c.h.bf16 %v224_v3  ;;  %v256_v7 = vunpack.c.h.bf16 %v225_v4  ;;  %v253_v8 = vunpack.c.l.bf16 %v224_v3  ;;  %v255_v9 = vunpack.c.l.bf16 %v225_v4  ;;  %v686_v10 = vld [vmem:[%s664_s18 + $0x28] sm:$0xff]  ;;  %v226_v11 = vld [vmem:[%s669_s21 + $0x10] sm:$0xff]  ;;  %v227_v12 = vld [vmem:[%s669_s21 + $0x18] sm:$0xff]  ;;  %s210_s29 = scalar_lea.vmem %s803_s3, %s604_s26 }
  0x14   : > { %v258_v13 = vunpack.c.h.bf16 %v226_v11  ;;  %v691_v14 = vld [vmem:[%s664_s18 + $0x20] sm:$0xff]  ;;  %v257_v15 = vunpack.c.l.bf16 %v226_v11  ;;  %v698_v20 = vld [vmem:[%s664_s18 + $0x38] sm:$0xff]  ;;  %v701_v21 = vld [vmem:[%s664_s18 + $0x30] sm:$0xff]  ;;  %v260_v23 = vunpack.c.h.bf16 %v227_v12  ;;  %v259_v25 = vunpack.c.l.bf16 %v227_v12 }
  0x15   : > { %v302_v16 = vmul.f32 %v254_v6, %v672_v0  ;;  %v304_v17 = vmul.f32 %v256_v7, %v675_v1  ;;  %v301_v18 = vmul.f32 %v253_v8, %v678_v2  ;;  %v303_v19 = vmul.f32 %v255_v9, %v683_v5  ;;  %v228_v22 = vld [vmem:[%s669_s21 + $0x20] sm:$0xff]  ;;  %v707_v27 = vld [vmem:[%s664_s18 + $0x48] sm:$0xff]  ;;  %v710_v28 = vld [vmem:[%s664_s18 + $0x58] sm:$0xff] }
  0x16   : > { %v306_v24 = vmul.f32 %v258_v13, %v686_v10  ;;  %v305_v26 = vmul.f32 %v257_v15, %v691_v14  ;;  %v229_v29 = vld [vmem:[%s669_s21 + $0x28] sm:$0xff]  ;;  %v262_v32 = vunpack.c.h.bf16 %v228_v22  ;;  %v714_v34 = vld [vmem:[%s664_s18 + $0x40] sm:$0xff]  ;;  %v230_v35 = vld [vmem:[%s669_s21 + $0x30] sm:$0xff]  ;;  %v308_v37 = vmul.f32 %v260_v23, %v698_v20 }
  0x17   : > { %v350_v30 = vpack.c.bf16 %v304_v17, %v302_v16  ;;  %v349_v31 = vpack.c.bf16 %v303_v19, %v301_v18  ;;  %v264_v33 = vunpack.c.h.bf16 %v229_v29  ;;  %v231_v36 = vld [vmem:[%s669_s21 + $0x38] sm:$0xff]  ;;  %v307_v38 = vmul.f32 %v259_v25, %v701_v21  ;;  %v722_v39 = vld [vmem:[%s664_s18 + $0x50] sm:$0xff]  ;;  %v232_v46 = vld [vmem:[%s669_s21 + $0x40] sm:$0xff] }
  0x18   : > { %v261_v40 = vunpack.c.l.bf16 %v228_v22  ;;  %v263_v41 = vunpack.c.l.bf16 %v229_v29  ;;  %v310_v42 = vmul.f32 %v262_v32, %v707_v27  ;;  %v266_v44 = vunpack.c.h.bf16 %v230_v35  ;;  %v233_v47 = vld [vmem:[%s669_s21 + $0x48] sm:$0xff]  ;;  %v234_v59 = vld [vmem:[%s669_s21 + $0x50] sm:$0xff]  ;;  %v235_v60 = vld [vmem:[%s669_s21 + $0x58] sm:$0xff] }
  0x19   : > { %577 = vmatprep.subr.bf16.mxu1 %v350_v30  ;;  %407 = vmatprep.subr.bf16.mxu0 %v350_v30  ;;  %v312_v43 = vmul.f32 %v264_v33, %v710_v28  ;;  %v268_v45 = vunpack.c.h.bf16 %v231_v36  ;;  %v352_v48 = vpack.c.bf16 %v308_v37, %v306_v24  ;;  %v351_v49 = vpack.c.bf16 %v307_v38, %v305_v26  ;;  %v615_v8 = vld [vmem:[%s735_s25 + $0x14] ss:$8 sps:$4 sm:$0xff]   ;;  %v618_v13 = vld [vmem:[%s735_s25 + $0x4] ss:$8 sps:$4 sm:$0xff]  }
  0x1a   : > { %589 = vmatpush1.bf16.msra.mxu1 %v349_v31  ;;  %408 = vmatpush1.bf16.msra.mxu0 %v349_v31  ;;  %v309_v50 = vmul.f32 %v261_v40, %v714_v34  ;;  %v265_v51 = vunpack.c.l.bf16 %v230_v35  ;;  %v311_v53 = vmul.f32 %v263_v41, %v722_v39  ;;  %v314_v54 = vmul.f32 %v266_v44, %v672_v0  ;;  %v236_v15 = vld [vmem:[%s669_s21 + $0x60] sm:$0xff]  ;;  %v237_v16 = vld [vmem:[%s669_s21 + $0x68] sm:$0xff]  ;;  %v238_v31 = vld [vmem:[%s669_s21 + $0x70] sm:$0xff] }
  0x1b   : > { %v354_v52 = vpack.c.bf16 %v312_v43, %v310_v42  ;;  %v316_v55 = vmul.f32 %v268_v45, %v675_v1  ;;  %578 = vmatprep.subr.bf16.mxu1 %v352_v48  ;;  %409 = vmatprep.subr.bf16.mxu0 %v352_v48  ;;  %v267_v56 = vunpack.c.l.bf16 %v231_v36  ;;  %v270_v57 = vunpack.c.h.bf16 %v232_v46  ;;  %v239_v32 = vld [vmem:[%s669_s21 + $0x78] sm:$0xff]  ;;  %v240_v45 = vld [vmem:[%s669_s21 + $0x80] sm:$0xff] }
  0x1c   : > { %v272_v58 = vunpack.c.h.bf16 %v233_v47  ;;  %v353_v61 = vpack.c.bf16 %v311_v53, %v309_v50  ;;  %v313_v62 = vmul.f32 %v265_v51, %v678_v2  ;;  %v269_v63 = vunpack.c.l.bf16 %v232_v46  ;;  %573 = vmatprep.mubr.msk.bf16.mxu1 %vm397_vm0, %v615_v8  ;;  %572 = vmatprep.mubr.msk.bf16.mxu0 %vm397_vm0, %v618_v13  ;;  %v241_v46 = vld [vmem:[%s669_s21 + $0x88] sm:$0xff] }
  0x1d   : > { %v315_v3 = vmul.f32 %v267_v56, %v683_v5  ;;  %v318_v4 = vmul.f32 %v270_v57, %v686_v10  ;;  %v271_v7 = vunpack.c.l.bf16 %v233_v47  ;;  %v356_v9 = vpack.c.bf16 %v316_v55, %v314_v54  ;;  %v242_v57 = vld [vmem:[%s669_s21 + $0x90] sm:$0xff] }
  0x1e   : > { %590 = vmatpush1.bf16.msra.mxu1 %v351_v49  ;;  %410 = vmatpush1.bf16.msra.mxu0 %v351_v49  ;;  %v320_v6 = vmul.f32 %v272_v58, %v698_v20  ;;  %v274_v11 = vunpack.c.h.bf16 %v234_v59  ;;  %v276_v12 = vunpack.c.h.bf16 %v235_v60  ;;  %v317_v17 = vmul.f32 %v269_v63, %v691_v14  ;;  %v243_v58 = vld [vmem:[%s669_s21 + $0x98] sm:$0xff] }
  0x1f   : > { %579 = vmatprep.subr.bf16.mxu1 %v354_v52  ;;  %411 = vmatprep.subr.bf16.mxu0 %v354_v52  ;;  %v273_v18 = vunpack.c.l.bf16 %v234_v59  ;;  %v275_v19 = vunpack.c.l.bf16 %v235_v60  ;;  %v355_v22 = vpack.c.bf16 %v315_v3, %v313_v62  ;;  %v319_v24 = vmul.f32 %v271_v7, %v701_v21 }
  0x20   : > { %v358_v23 = vpack.c.bf16 %v320_v6, %v318_v4  ;;  %v322_v25 = vmul.f32 %v274_v11, %v707_v27  ;;  %v324_v26 = vmul.f32 %v276_v12, %v710_v28  ;;  %v278_v29 = vunpack.c.h.bf16 %v236_v15  ;;  %v245_v11 = vld [vmem:[%s669_s21 + $0xa8] sm:$0xff] }
  0x21   : > { %v280_v30 = vunpack.c.h.bf16 %v237_v16  ;;  %v321_v33 = vmul.f32 %v273_v18, %v714_v34  ;;  %v323_v35 = vmul.f32 %v275_v19, %v722_v39  ;;  %v357_v36 = vpack.c.bf16 %v319_v24, %v317_v17 }
  0x22   : > { %591 = vmatpush1.bf16.msra.mxu1 %v353_v61  ;;  %412 = vmatpush1.bf16.msra.mxu0 %v353_v61  ;;  %v277_v37 = vunpack.c.l.bf16 %v236_v15  ;;  %v279_v38 = vunpack.c.l.bf16 %v237_v16  ;;  %v282_v40 = vunpack.c.h.bf16 %v238_v31  ;;  %v360_v41 = vpack.c.bf16 %v324_v26, %v322_v25  ;;  %v246_v25 = vld [vmem:[%s669_s21 + $0xb0] sm:$0xff]  ;;  %v247_v26 = vld [vmem:[%s669_s21 + $0xb8] sm:$0xff] }
  0x23   : > { %580 = vmatprep.subr.bf16.mxu1 %v356_v9  ;;  %413 = vmatprep.subr.bf16.mxu0 %v356_v9  ;;  %v326_v42 = vmul.f32 %v278_v29, %v672_v0  ;;  %v328_v43 = vmul.f32 %v280_v30, %v675_v1  ;;  %v284_v44 = vunpack.c.h.bf16 %v239_v32  ;;  %v359_v47 = vpack.c.bf16 %v323_v35, %v321_v33  ;;  %v244_v9 = vld [vmem:[%s669_s21 + $0xa0] sm:$0xff] }
  0x24   : > { %v281_v48 = vunpack.c.l.bf16 %v238_v31  ;;  %v283_v49 = vunpack.c.l.bf16 %v239_v32  ;;  %v325_v50 = vmul.f32 %v277_v37, %v678_v2  ;;  %v327_v51 = vmul.f32 %v279_v38, %v683_v5 }
  0x25   : > { %v330_v52 = vmul.f32 %v282_v40, %v686_v10  ;;  %v362_v53 = vpack.c.bf16 %v328_v43, %v326_v42  ;;  %v332_v54 = vmul.f32 %v284_v44, %v698_v20  ;;  %v286_v55 = vunpack.c.h.bf16 %v240_v45 }
  0x26   : > { %592 = vmatpush1.bf16.msra.mxu1 %v355_v22  ;;  %414 = vmatpush1.bf16.msra.mxu0 %v355_v22  ;;  %v288_v56 = vunpack.c.h.bf16 %v241_v46  ;;  %v329_v59 = vmul.f32 %v281_v48, %v691_v14  ;;  %v331_v60 = vmul.f32 %v283_v49, %v701_v21  ;;  %v285_v61 = vunpack.c.l.bf16 %v240_v45 }
  0x27   : > { %581 = vmatprep.subr.bf16.mxu1 %v358_v23  ;;  %415 = vmatprep.subr.bf16.mxu0 %v358_v23  ;;  %v361_v62 = vpack.c.bf16 %v327_v51, %v325_v50  ;;  %v287_v63 = vunpack.c.l.bf16 %v241_v46  ;;  %v290_v3 = vunpack.c.h.bf16 %v242_v57  ;;  %v292_v4 = vunpack.c.h.bf16 %v243_v58  ;;  %v613_v46 = vld [vmem:[%s735_s25 + $0x10] ss:$8 sps:$4 sm:$0xff]  }
  0x28   : > { %v364_v6 = vpack.c.bf16 %v332_v54, %v330_v52  ;;  %v334_v7 = vmul.f32 %v286_v55, %v707_v27  ;;  %v336_v8 = vmul.f32 %v288_v56, %v710_v28  ;;  %v363_v12 = vpack.c.bf16 %v331_v60, %v329_v59 }
  0x29   : > { %v333_v13 = vmul.f32 %v285_v61, %v714_v34  ;;  %v289_v15 = vunpack.c.l.bf16 %v242_v57  ;;  %v291_v16 = vunpack.c.l.bf16 %v243_v58  ;;  %v335_v17 = vmul.f32 %v287_v63, %v722_v39 }
  0x2a   : > { %593 = vmatpush1.bf16.msra.mxu1 %v357_v36  ;;  %416 = vmatpush1.bf16.msra.mxu0 %v357_v36  ;;  %v338_v18 = vmul.f32 %v290_v3, %v672_v0  ;;  %v340_v19 = vmul.f32 %v292_v4, %v675_v1  ;;  %v366_v22 = vpack.c.bf16 %v336_v8, %v334_v7  ;;  %v294_v23 = vunpack.c.h.bf16 %v244_v9 }
  0x2b   : > { %582 = vmatprep.subr.bf16.mxu1 %v360_v41  ;;  %417 = vmatprep.subr.bf16.mxu0 %v360_v41  ;;  %v296_v24 = vunpack.c.h.bf16 %v245_v11  ;;  %v337_v29 = vmul.f32 %v289_v15, %v678_v2  ;;  %v339_v30 = vmul.f32 %v291_v16, %v683_v5  ;;  %v365_v31 = vpack.c.bf16 %v335_v17, %v333_v13 }
  0x2c   : > { %v368_v32 = vpack.c.bf16 %v340_v19, %v338_v18  ;;  %v293_v33 = vunpack.c.l.bf16 %v244_v9  ;;  %v295_v35 = vunpack.c.l.bf16 %v245_v11  ;;  %v342_v0 = vmul.f32 %v294_v23, %v686_v10 }
  0x2d   : > { %v344_v1 = vmul.f32 %v296_v24, %v698_v20  ;;  %v298_v36 = vunpack.c.h.bf16 %v246_v25  ;;  %v300_v37 = vunpack.c.h.bf16 %v247_v26  ;;  %v367_v38 = vpack.c.bf16 %v339_v30, %v337_v29 }
  0x2e   : > { %594 = vmatpush1.bf16.msra.mxu1 %v359_v47  ;;  %418 = vmatpush1.bf16.msra.mxu0 %v359_v47  ;;  %v341_v2 = vmul.f32 %v293_v33, %v691_v14  ;;  %v343_v5 = vmul.f32 %v295_v35, %v701_v21  ;;  %v297_v40 = vunpack.c.l.bf16 %v246_v25  ;;  %v299_v41 = vunpack.c.l.bf16 %v247_v26 }
  0x2f   : > { %583 = vmatprep.subr.bf16.mxu1 %v362_v53  ;;  %419 = vmatprep.subr.bf16.mxu0 %v362_v53  ;;  %v370_v42 = vpack.c.bf16 %v344_v1, %v342_v0  ;;  %v346_v43 = vmul.f32 %v298_v36, %v707_v27  ;;  %v348_v10 = vmul.f32 %v300_v37, %v710_v28  ;;  %v252_v27 = vld [vmem:[%s735_s25 + $0x20] sm:$0x33] }
  0x30   : > { %v369_v20 = vpack.c.bf16 %v343_v5, %v341_v2  ;;  %v345_v44 = vmul.f32 %v297_v40, %v714_v34  ;;  %v347_v14 = vmul.f32 %v299_v41, %v722_v39  ;;  %v616_v28 = vld [vmem:[%s735_s25] ss:$8 sps:$4 sm:$0xff]   ;;  %v571_v47 = vcombine.high %v252_v27, %v252_v27 }
  0x31   : > { %v372_v21 = vpack.c.bf16 %v348_v10, %v346_v43  ;;  %v570_v34 = vcombine.low %v252_v27, %v252_v27 }
  0x32   : > { %595 = vmatpush1.bf16.msra.mxu1 %v361_v62  ;;  %420 = vmatpush1.bf16.msra.mxu0 %v361_v62  ;;  %v371_v45 = vpack.c.bf16 %v347_v14, %v345_v44 }
  0x33   : > { %584 = vmatprep.subr.bf16.mxu1 %v364_v6  ;;  %421 = vmatprep.subr.bf16.mxu0 %v364_v6 }
  0x36   : > { %596 = vmatpush1.bf16.msra.mxu1 %v363_v12  ;;  %422 = vmatpush1.bf16.msra.mxu0 %v363_v12 }
  0x37   : > { %585 = vmatprep.subr.bf16.mxu1 %v366_v22  ;;  %423 = vmatprep.subr.bf16.mxu0 %v366_v22 }
  0x3a   : > { %597 = vmatpush1.bf16.msra.mxu1 %v365_v31  ;;  %424 = vmatpush1.bf16.msra.mxu0 %v365_v31 }
  0x3b   : > { %586 = vmatprep.subr.bf16.mxu1 %v368_v32  ;;  %425 = vmatprep.subr.bf16.mxu0 %v368_v32 }
  0x3e   : > { %598 = vmatpush1.bf16.msra.mxu1 %v367_v38  ;;  %426 = vmatpush1.bf16.msra.mxu0 %v367_v38 }
  0x3f   : > { %587 = vmatprep.subr.bf16.mxu1 %v370_v42  ;;  %427 = vmatprep.subr.bf16.mxu0 %v370_v42 }
  0x42   : > { %599 = vmatpush1.bf16.msra.mxu1 %v369_v20  ;;  %428 = vmatpush1.bf16.msra.mxu0 %v369_v20 }
  0x43   : > { %588 = vmatprep.subr.bf16.mxu1 %v372_v21  ;;  %429 = vmatprep.subr.bf16.mxu0 %v372_v21 }
  0x46   : > { %600 = vmatpush1.bf16.msra.mxu1 %v371_v45  ;;  %430 = vmatpush1.bf16.msra.mxu0 %v371_v45 }
  0x49   : > { %450 = vmatmul.mubr.bf16.vlgmr.msra.gmra.mrb[0].mxu1 %v613_v46  ;;  %440 = vmatmul.mubr.bf16.vlgmr.msra.gmra.mrb[0].mxu0 %v616_v28 }
  0x4a   : > { %574 = vmatprep.mubr.msk.bf16.mxu1 %vm397_vm0, %v571_v47 }
  0x51   : > { %460 = vmatmul.mubr.bf16.gmra.mrb[4].mxu1 %v570_v34 }
 0x11c   : > { %v451_v39 = vpop.f32.mrb[0].mxu1  ;;  %v441_v48 = vpop.f32.mrb[0].mxu0 }
 0x11d   : > { %472 = vst [vmem:[%s210_s29 + $0x20] sm:$0xff] %v451_v39  ;;  %v453_v49 = vpop.f32.mrb[1].mxu1  ;;  %468 = vst [vmem:[%s210_s29] sm:$0xff] %v441_v48  ;;  %v443_v50 = vpop.f32.mrb[1].mxu0 }
 0x11e   : > { %473 = vst [vmem:[%s210_s29 + $0x28] sm:$0xff] %v453_v49  ;;  %v455_v51 = vpop.f32.mrb[2].mxu1  ;;  %469 = vst [vmem:[%s210_s29 + $0x8] sm:$0xff] %v443_v50  ;;  %v445_v52 = vpop.f32.mrb[2].mxu0 }
 0x11f   : > { %474 = vst [vmem:[%s210_s29 + $0x30] sm:$0xff] %v455_v51  ;;  %v457_v53 = vpop.f32.mrb[3].mxu1  ;;  %470 = vst [vmem:[%s210_s29 + $0x10] sm:$0xff] %v445_v52  ;;  %v447_v54 = vpop.f32.mrb[3].mxu0 }
 0x120   : > { %475 = vst [vmem:[%s210_s29 + $0x38] sm:$0xff] %v457_v53  ;;  %471 = vst [vmem:[%s210_s29 + $0x18] sm:$0xff] %v447_v54 }
 0x124   : > { %v461_v55 = vpop.f32.mrb[4].mxu1 }
 0x125   : > { %476 = vst [vmem:[%s210_s29 + $0x40] sm:$0xf] %v461_v55  ;;  %v463_v56 = vpop.f32.mrb[5].mxu1 }
 0x126   : > { %477 = vst [vmem:[%s210_s29 + $0x48] sm:$0xf] %v463_v56  ;;  %v465_v57 = vpop.f32.mrb[6].mxu1 }
 0x127   : > { %v466_v58 = vpop.f32.mrb[7].mxu1 }
 0x128 PF: > { %s13_s12 = sadd.s32 1, %s627_s12  }
 0x129   : > { %p10_p4 = scmp.ge.s32.totalorder %s13_s12, 6  }
 0x12b   :  { %12 = sbr.rel (!%p10_p4) target bundleno = 1 (0x1), region = 68 }

</bundles_post_ra>
